<compile_context>
chip_gen: v7x
topology: tpu7x:2x2x1
jax: 0.10.0
libtpu: 0.0.40
codegen_flags: <defaults>
</compile_context>

<pallas_src>
import functools

import jax
import jax.numpy as jnp
from jax import lax
from jax.experimental import pallas as pl
from jax.experimental.pallas import tpu as pltpu


def _round_up(x, m):
    return ((x + m - 1) // m) * m


def _cdiv(a, b):
    return -(-a // b)


def fuse_gate_up_weights(w_gate, w_up):
    """Stack gate/up projection weights into one [2, I, H] tensor.

    Call ONCE at weight-load time (this mirrors the PyTorch module's fused
    w1w2 parameter), so the kernel streams a single fused weight and issues
    one wide (tm, 2*ti) matmul per reduction step.
    """
    assert w_gate.shape == w_up.shape
    return jnp.stack([w_gate, w_up], axis=0)


def _tpu_policy():
    """Per-generation defaults: (tm_cap, ti_align, vmem_limit_bytes)."""
    kind = ""
    try:
        kind = jax.devices()[0].device_kind.lower()
    except Exception:
        pass
    vmem_cap = None
    try:
        info = pltpu.get_tpu_info()
        vmem_cap = int(getattr(info, "vmem_capacity_bytes"))
    except Exception:
        vmem_cap = None

    is_v5e = ("v5e" in kind) or ("v5 lite" in kind) or ("v5lite" in kind)
    is_v7 = "v7" in kind
    if vmem_cap is None or vmem_cap <= 0:
        vmem_cap = (64 << 20) if is_v7 else (128 << 20)

    if is_v5e:
        tm_cap, ti_align = 256, 128     # 197 TF/s vs 0.82 TB/s -> small tm OK
    else:
        tm_cap, ti_align = 768, 256     # v6e/v7x: 256-wide MXU, high flops/B need

    vmem_limit = int(0.8 * vmem_cap)    # ~102 MiB on 128 MiB parts, ~51 MiB on v7x
    return tm_cap, ti_align, vmem_limit


def _swiglu_kernel(x_ref, wgu_ref, wd_ref, o_ref, acc_ref, *, num_k):
    # x_ref  : (tm, H)        token tile (k-invariant)
    # wgu_ref: (2, ti, H)     fused [gate; up] weight slice (native [I, H] rows)
    # wd_ref : (H, ti)        down_proj.weight slice (native [H, I] layout)
    # o_ref  : (tm, H)        output tile (k-invariant)
    # acc_ref: (tm, H) f32    accumulator scratch, persists across the I axis
    k = pl.program_id(1)
    ti = wgu_ref.shape[1]
    hidden = wgu_ref.shape[2]

    x = x_ref[...]
    # Collapse [2, ti, H] -> [2*ti, H]; ti is a multiple of the sublane tile so
    # this is a layout-preserving fold (same pattern as paged-attention KV).
    w_gu = wgu_ref[...].reshape(2 * ti, hidden)

    # Contract the shared H / I axes directly (x @ W^T) -- no wrapper transpose.
    dn = (((1,), (1,)), ((), ()))
    gu = lax.dot_general(x, w_gu, dimension_numbers=dn,
                         preferred_element_type=jnp.float32)    # (tm, 2*ti)
    gate = gu[:, :ti]
    up = gu[:, ti:]

    # SiLU in f32; sigmoid lowers to the EUP logistic (frees VALU slots).
    h = (gate * jax.nn.sigmoid(gate)) * up                      # (tm, ti) f32

    # Partial down_proj: (tm, ti) x (H, ti) contracted over ti -> (tm, H).
    partial = lax.dot_general(h.astype(wd_ref.dtype), wd_ref[...],
                              dimension_numbers=dn,
                              preferred_element_type=jnp.float32)

    if num_k == 1:
        # Single reduction step: skip the accumulator entirely.
        o_ref[...] = partial.astype(o_ref.dtype)
    else:
        @pl.when(k == 0)
        def _():
            acc_ref[...] = partial          # store first partial (no zero-init)

        @pl.when(jnp.logical_and(k > 0, k < num_k - 1))
        def _():
            acc_ref[...] += partial

        @pl.when(k == num_k - 1)
        def _():
            o_ref[...] = (acc_ref[...] + partial).astype(o_ref.dtype)


def llama_mlp_swiglu_fused(x, w_gate_up, w_down, *, tm=None, ti=None,
                           vmem_limit_bytes=None, single_buffer_x_out=False,
                           weight_buffers=2, interpret=False):
    """Fused SwiGLU MLP with pre-fused gate/up weights.

    x         : [batch, seq, hidden]
    w_gate_up : [2, intermediate, hidden]  (stack of gate_proj / up_proj weights,
                 build once with fuse_gate_up_weights at load time)
    w_down    : [hidden, intermediate]     (down_proj.weight, native layout)
    returns   : [batch, seq, hidden]
    """
    assert x.ndim == 3
    batch, seq, hidden = x.shape
    assert w_gate_up.ndim == 3 and w_gate_up.shape[0] == 2
    inter = w_gate_up.shape[1]
    assert w_gate_up.shape[2] == hidden
    assert w_down.shape == (hidden, inter)

    M = batch * seq
    x2d = x.reshape(M, hidden)

    act_b = jnp.dtype(x.dtype).itemsize
    w_b = jnp.dtype(w_gate_up.dtype).itemsize

    tm_cap, ti_align, vmem_limit_default = _tpu_policy()
    if vmem_limit_bytes is None:
        vmem_limit_bytes = vmem_limit_default
    # Leave headroom for Mosaic internal scratch / spills when auto-tiling.
    budget = max(vmem_limit_bytes - (4 << 20), 8 << 20)
    bufs_act = 1 if single_buffer_x_out else 2

    # ---- token tile (tm): pad ragged M instead of shrinking the tile --------
    user_tm, user_ti = tm, ti
    if user_tm is None:
        if M <= tm_cap:
            tm = _round_up(max(M, 1), 16)
        else:
            n_tiles = _cdiv(M, tm_cap)
            tm = _round_up(_cdiv(M, n_tiles), 128)
    assert tm % 8 == 0, "tm must be a multiple of 8 (sublane rule)"

    # ---- intermediate tile (ti): largest divisor of I that fits VMEM --------
    def _pick_ti(tm_):
        fixed = (2 * bufs_act * tm_ * hidden * act_b     # x + out tiles
                 + tm_ * hidden * 4)                      # f32 accumulator
        def need(t):
            return (fixed
                    + 2 * 3 * t * hidden * w_b            # wg/wu/wd, 2x buffered
                    + 3 * tm_ * t * 4)                    # gu + h f32 temporaries
        cands = [t for t in range(128, inter + 1, 128) if inter % t == 0]
        if not cands:
            cands = [inter]
        fitting = [t for t in cands if need(t) <= budget]
        if not fitting:
            return None
        pref = [t for t in fitting if t % ti_align == 0]
        return max(pref) if pref else max(fitting)

    if user_ti is None:
        ti = _pick_ti(tm)
        while ti is None and user_tm is None and tm > 128:
            tm = max(128, _round_up(tm // 2, 16))
            ti = _pick_ti(tm)
        if ti is None:
            cands = [t for t in range(128, inter + 1, 128) if inter % t == 0]
            ti = min(cands) if cands else inter
    assert inter % ti == 0 and ti % 8 == 0, \
        "ti must divide I and be a multiple of 8 (128 preferred)"

    M_pad = _round_up(M, tm)
    if M_pad != M:
        x2d = jnp.pad(x2d, ((0, M_pad - M), (0, 0)))

    grid = (M_pad // tm, inter // ti)   # reduction axis last

    # ---- BlockSpecs ----------------------------------------------------------
    if single_buffer_x_out:
        # x/out block indices are constant over k -> second buffer is dead weight.
        x_spec = pl.BlockSpec((tm, hidden), lambda i, k: (i, 0),
                              pipeline_mode=pl.Buffered(1))
        o_spec = pl.BlockSpec((tm, hidden), lambda i, k: (i, 0),
                              pipeline_mode=pl.Buffered(1))
    else:
        x_spec = pl.BlockSpec((tm, hidden), lambda i, k: (i, 0))
        o_spec = pl.BlockSpec((tm, hidden), lambda i, k: (i, 0))

    w_pipe = {} if weight_buffers == 2 else dict(
        pipeline_mode=pl.Buffered(weight_buffers))
    wgu_spec = pl.BlockSpec((2, ti, hidden), lambda i, k: (0, k, 0), **w_pipe)
    wd_spec = pl.BlockSpec((hidden, ti), lambda i, k: (0, k), **w_pipe)

    cost = pl.CostEstimate(
        flops=6 * M_pad * hidden * inter,                 # 3 matmuls x 2*M*H*I
        transcendentals=M_pad * inter,                    # sigmoid exp
        bytes_accessed=(M_pad * hidden * act_b            # x read
                        + M_pad * hidden * act_b          # out write
                        + grid[0] * 3 * inter * hidden * w_b),  # weight re-stream
    )

    kernel = functools.partial(_swiglu_kernel, num_k=grid[1])

    out2d = pl.pallas_call(
        kernel,
        out_shape=jax.ShapeDtypeStruct((M_pad, hidden), x.dtype),
        grid_spec=pltpu.PrefetchScalarGridSpec(
            num_scalar_prefetch=0,
            grid=grid,
            in_specs=[x_spec, wgu_spec, wd_spec],
            out_specs=o_spec,
            scratch_shapes=[pltpu.VMEM((tm, hidden), jnp.float32)],
        ),
        compiler_params=pltpu.CompilerParams(
            dimension_semantics=("parallel", "arbitrary"),
            vmem_limit_bytes=int(vmem_limit_bytes)),
        cost_estimate=cost,
        interpret=interpret,
    )(x2d, w_gate_up, w_down)

    if M_pad != M:
        out2d = out2d[:M]
    return out2d.reshape(batch, seq, hidden)


def llama_mlp_swiglu(x, w_gate, w_up, w_down, **kwargs):
    """Convenience wrapper taking separate gate/up weights.

    For production use, call fuse_gate_up_weights() once at weight-load time
    and use llama_mlp_swiglu_fused() directly to avoid a per-call weight stack.
    """
    return llama_mlp_swiglu_fused(x, fuse_gate_up_weights(w_gate, w_up),
                                  w_down, **kwargs)


if __name__ == "__main__":
    # Small, lane-friendly config: hidden=128, intermediate=512.
    batch, seq, hidden, inter = 2, 8, 128, 512

    key = jax.random.PRNGKey(0)
    kx, kg, ku, kd = jax.random.split(key, 4)

    x = jax.random.normal(kx, (batch, seq, hidden), dtype=jnp.float32)
    w_gate = jax.random.normal(kg, (inter, hidden), dtype=jnp.float32) * 0.05
    w_up = jax.random.normal(ku, (inter, hidden), dtype=jnp.float32) * 0.05
    w_down = jax.random.normal(kd, (hidden, inter), dtype=jnp.float32) * 0.05

    w_gu = fuse_gate_up_weights(w_gate, w_up)   # done once, like the module's w1w2

    # Pure-JAX reference.
    ref = (jax.nn.silu(x @ w_gate.T) * (x @ w_up.T)) @ w_down.T

    # 1) f32, explicit tiny tiles -> multi-step reduction grid (2 M-tiles x 4 I-tiles)
    #    exercises first-store / accumulate / final add-and-write paths.
    out = llama_mlp_swiglu_fused(x, w_gu, w_down, tm=8, ti=128)
    out = jax.block_until_ready(out)
    assert out.shape == (batch, seq, hidden)
    assert jnp.allclose(out, ref, atol=1e-4, rtol=1e-4), "f32 mismatch vs reference"

    # 2) ragged token count (M=5) with auto tile policy -> pads M, single k-step.
    xr = x[:1, :5]
    refr = (jax.nn.silu(xr @ w_gate.T) * (xr @ w_up.T)) @ w_down.T
    outr = jax.block_until_ready(llama_mlp_swiglu(xr, w_gate, w_up, w_down))
    assert outr.shape == xr.shape
    assert jnp.allclose(outr, refr, atol=1e-4, rtol=1e-4), "ragged-M mismatch"

    # 3) bf16 path (MXU-native dtype) with auto tile selection; loose tolerance.
    out_bf16 = llama_mlp_swiglu_fused(x.astype(jnp.bfloat16),
                                      w_gu.astype(jnp.bfloat16),
                                      w_down.astype(jnp.bfloat16))
    out_bf16 = jax.block_until_ready(out_bf16)
    max_err = jnp.max(jnp.abs(out_bf16.astype(jnp.float32) - ref))
    assert max_err < 0.1, f"bf16 mismatch vs reference (max err {max_err})"

    print("KERNEL_OK")
</pallas_src>

<mosaic_0001>
module attributes {stable_mosaic.version = 11 : i64} {
  func.func @_swiglu_kernel(%arg0: i32, %arg1: i32, %arg2: memref<8x128xf32, #tpu.memory_space<vmem>>, %arg3: memref<2x128x128xf32, #tpu.memory_space<vmem>>, %arg4: memref<128x128xf32, #tpu.memory_space<vmem>>, %arg5: memref<8x128xf32, #tpu.memory_space<vmem>>, %arg6: memref<8x128xf32, #tpu.memory_space<vmem>>) attributes {dimension_semantics = [#tpu.dimension_semantics<parallel>, #tpu.dimension_semantics<arbitrary>], iteration_bounds = array<i64: 2, 4>, scalar_prefetch = 0 : i64, scratch_operands = 1 : i64, tpu.core_type = #tpu.core_type<tc>, window_params = [{transform_indices = @transform_0, window_bounds = array<i64: 8, 128>}, {transform_indices = @transform_1, window_bounds = array<i64: 2, 128, 128>}, {transform_indices = @transform_2, window_bounds = array<i64: 128, 128>}, {transform_indices = @transform_3, window_bounds = array<i64: 8, 128>}]} {
    %c0 = arith.constant 0 : index
    %c0_0 = arith.constant 0 : index
    %0 = vector.load %arg2[%c0, %c0_0] : memref<8x128xf32, #tpu.memory_space<vmem>>, vector<8x128xf32>
    %c0_1 = arith.constant 0 : index
    %c0_2 = arith.constant 0 : index
    %c0_3 = arith.constant 0 : index
    %1 = vector.load %arg3[%c0_1, %c0_2, %c0_3] : memref<2x128x128xf32, #tpu.memory_space<vmem>>, vector<2x128x128xf32>
    %2 = vector.shape_cast %1 : vector<2x128x128xf32> to vector<256x128xf32>
    %cst = arith.constant dense<0.000000e+00> : vector<8x256xf32>
    %3 = tpu.matmul %0, %2, %cst {dimension_numbers = #tpu.dot_dimension_numbers<[1], [1], [0], [0], [0, 0, 1, 0], [], []>} : vector<8x128xf32>, vector<256x128xf32>, vector<8x256xf32> -> vector<8x256xf32>
    %4 = vector.extract_strided_slice %3 {offsets = [0, 0], sizes = [8, 128], strides = [1, 1]} : vector<8x256xf32> to vector<8x128xf32>
    %5 = vector.extract_strided_slice %3 {offsets = [0, 128], sizes = [8, 128], strides = [1, 1]} : vector<8x256xf32> to vector<8x128xf32>
    %6 = arith.negf %4 : vector<8x128xf32>
    %7 = math.exp %6 : vector<8x128xf32>
    %cst_4 = arith.constant 1.000000e+00 : f32
    %8 = vector.broadcast %cst_4 : f32 to vector<8x128xf32>
    %9 = arith.addf %8, %7 : vector<8x128xf32>
    %10 = arith.divf %8, %9 : vector<8x128xf32>
    %11 = arith.mulf %4, %10 : vector<8x128xf32>
    %12 = arith.mulf %11, %5 : vector<8x128xf32>
    %c0_5 = arith.constant 0 : index
    %c0_6 = arith.constant 0 : index
    %13 = vector.load %arg4[%c0_5, %c0_6] : memref<128x128xf32, #tpu.memory_space<vmem>>, vector<128x128xf32>
    %cst_7 = arith.constant dense<0.000000e+00> : vector<8x128xf32>
    %14 = tpu.matmul %12, %13, %cst_7 {dimension_numbers = #tpu.dot_dimension_numbers<[1], [1], [0], [0], [0, 0, 1, 0], [], []>} : vector<8x128xf32>, vector<128x128xf32>, vector<8x128xf32> -> vector<8x128xf32>
    %c0_i32 = arith.constant 0 : i32
    %15 = arith.cmpi eq, %arg1, %c0_i32 : i32
    %16 = arith.extui %15 : i1 to i32
    %c0_i32_8 = arith.constant 0 : i32
    %17 = arith.cmpi ne, %16, %c0_i32_8 : i32
    scf.if %17 {
      %c0_13 = arith.constant 0 : index
      %c0_14 = arith.constant 0 : index
      %26 = vector.load %arg6[%c0_13, %c0_14] : memref<8x128xf32, #tpu.memory_space<vmem>>, vector<8x128xf32>
      tpu.vector_store %arg6[%c0_13, %c0_14], %14 {strides = array<i32>} : memref<8x128xf32, #tpu.memory_space<vmem>>, vector<8x128xf32>,
    } else {
    }
    %c0_i32_9 = arith.constant 0 : i32
    %18 = arith.cmpi sgt, %arg1, %c0_i32_9 : i32
    %c3_i32 = arith.constant 3 : i32
    %19 = arith.cmpi slt, %arg1, %c3_i32 : i32
    %20 = arith.andi %18, %19 : i1
    %21 = arith.extui %20 : i1 to i32
    %c0_i32_10 = arith.constant 0 : i32
    %22 = arith.cmpi ne, %21, %c0_i32_10 : i32
    scf.if %22 {
      %c0_13 = arith.constant 0 : index
      %c0_14 = arith.constant 0 : index
      %26 = vector.load %arg6[%c0_13, %c0_14] : memref<8x128xf32, #tpu.memory_space<vmem>>, vector<8x128xf32>
      %27 = arith.addf %26, %14 : vector<8x128xf32>
      %c0_15 = arith.constant 0 : index
      %c0_16 = arith.constant 0 : index
      %28 = vector.load %arg6[%c0_15, %c0_16] : memref<8x128xf32, #tpu.memory_space<vmem>>, vector<8x128xf32>
      tpu.vector_store %arg6[%c0_15, %c0_16], %27 {strides = array<i32>} : memref<8x128xf32, #tpu.memory_space<vmem>>, vector<8x128xf32>,
    } else {
    }
    %c3_i32_11 = arith.constant 3 : i32
    %23 = arith.cmpi eq, %arg1, %c3_i32_11 : i32
    %24 = arith.extui %23 : i1 to i32
    %c0_i32_12 = arith.constant 0 : i32
    %25 = arith.cmpi ne, %24, %c0_i32_12 : i32
    scf.if %25 {
      %c0_13 = arith.constant 0 : index
      %c0_14 = arith.constant 0 : index
      %26 = vector.load %arg6[%c0_13, %c0_14] : memref<8x128xf32, #tpu.memory_space<vmem>>, vector<8x128xf32>
      %27 = arith.addf %26, %14 : vector<8x128xf32>
      %c0_15 = arith.constant 0 : index
      %c0_16 = arith.constant 0 : index
      %28 = vector.load %arg5[%c0_15, %c0_16] : memref<8x128xf32, #tpu.memory_space<vmem>>, vector<8x128xf32>
      tpu.vector_store %arg5[%c0_15, %c0_16], %27 {strides = array<i32>} : memref<8x128xf32, #tpu.memory_space<vmem>>, vector<8x128xf32>,
    } else {
    }
    return
  }
  func.func @transform_0(%arg0: i32, %arg1: i32) -> (i32, i32) {
    %c0_i32 = arith.constant 0 : i32
    %c0_i32_0 = arith.constant 0 : i32
    return %arg0, %c0_i32 : i32, i32
  }
  func.func @transform_1(%arg0: i32, %arg1: i32) -> (i32, i32, i32) {
    %c0_i32 = arith.constant 0 : i32
    %c0_i32_0 = arith.constant 0 : i32
    %c0_i32_1 = arith.constant 0 : i32
    return %c0_i32, %arg1, %c0_i32_0 : i32, i32, i32
  }
  func.func @transform_2(%arg0: i32, %arg1: i32) -> (i32, i32) {
    %c0_i32 = arith.constant 0 : i32
    %c0_i32_0 = arith.constant 0 : i32
    return %c0_i32, %arg1 : i32, i32
  }
  func.func @transform_3(%arg0: i32, %arg1: i32) -> (i32, i32) {
    %c0_i32 = arith.constant 0 : i32
    %c0_i32_0 = arith.constant 0 : i32
    return %arg0, %c0_i32 : i32, i32
  }
}

</mosaic_0001>

<bundles_post_ra>
// kernel: tpu_custom_call.1
= control target key start
LH: loop header
LB: loop body
LE: loop exit
PB: predicated region body
PF: predicated region fallthrough
CT: control target
= control target key end

     0   :  { %s1534_s0 = inlined_call_operand.hbm [shape: f32[16,128], index: 0, kind: input, shape index: {}]   ;;  %s1535_s1 = inlined_call_operand.hbm [shape: f32[2,512,128], index: 1, kind: input, shape index: {}]   ;;  %s1536_s2 = inlined_call_operand.hbm [shape: f32[128,512], index: 2, kind: input, shape index: {}]   ;;  %s1537_s3 = inlined_call_operand.hbm [shape: f32[16,128], index: 3, kind: output, shape index: {}]  }
   0x1   :  { %1548 = sst [smem:[#allocation23_spill]] %s1534_s0 }
   0x2   :  { %1549 = sst [smem:[#allocation24_spill]] %s1535_s1 }
   0x3   :  { %8 = vsyncpa [#allocation4], 0 }
   0x4   :  { %10 = vsyncpa [#allocation4 + $0x1], 0 }
   0x5   :  { %11 = vsyncpa [#allocation7], 0 }
   0x6   :  { %13 = vsyncpa [#allocation7 + $0x1], 0 }
   0x7   :  { %14 = vsyncpa [#allocation5], 0 }
   0x8   :  { %16 = vsyncpa [#allocation5 + $0x1], 0  ;;  %s1168_s12 = smov 0   ;;  %s1170_s13 = smov 0  }
   0x9   :  { %s1172_s14 = smov 0   ;;  %s1174_s15 = smov 0  }
   0xa   :  { %s1176_s16 = smov 0   ;;  %s1178_s17 = smov 0  }
   0xb   :  { %s1180_s18 = smov 0   ;;  %s1182_s19 = smov 0  }
   0xc   :  { %s1184_s20 = smov 0   ;;  %s1186_s21 = smov 0  }
   0xd   :  { %s1188_s22 = smov 0  }
   0xe LB: > { %1550 = sst [smem:[#allocation16_spill]] %s1111_s17  ;;  %s1224_s23 = sadd.s32 4294967295, %s1131_s22   ;;  %s1131_s22 = sphi %s1188_s22, %s22_s22   ;;  %s1127_s21 = sphi %s1186_s21, %s1577_s21   ;;  %s1123_s20 = sphi %s1184_s20, %s1584_s20   ;;  %s1119_s19 = sphi %s1182_s19, %s1575_s19   ;;  %s1115_s18 = sphi %s1180_s18, %s1583_s18   ;;  %s1111_s17 = sphi %s1178_s17, %s1574_s17   ;;  %s1107_s16 = sphi %s1176_s16, %s1582_s16   ;;  %s1103_s15 = sphi %s1174_s15, %s1581_s15   ;;  %s1099_s14 = sphi %s1172_s14, %s1580_s14   ;;  %s1095_s13 = sphi %s1170_s13, %s1579_s13   ;;  %s1091_s12 = sphi %s1168_s12, %s1578_s12  }
   0xf   : > { %1551 = sst [smem:[#allocation17_spill]] %s1127_s21  ;;  %s658_s24 = sadd.s32 4294967294, %s1131_s22  }
  0x10   : > { %s31_s25 = sadd.s32 1, %s1123_s20  ;;  %s34_s26 = sadd.s32 1, %s1127_s21 }
  0x11   : > { %p32_p0 = scmp.ge.s32.totalorder %s31_s25, 4  ;;  %s41_s27 = sadd.s32 1, %s1111_s17 }
  0x12   : > { %p48_p1 = scmp.ne.s32.totalorder %s1111_s17, %s1107_s16  ;;  %p49_p2 = scmp.eq.s32.totalorder %s1131_s22, 0 }
  0x13   : > { %s1586_s25 = smov (%p32_p0, %s31_s25), 0  ;;  %s1588_s26 = smov (!%p32_p0, %s34_s26), %s1127_s21 }
  0x14   : > { %1552 = sst [smem:[#allocation18_spill]] %s1586_s25  ;;  %p1241_p3 = por %p49_p2, %p48_p1 }
  0x15   : > { %p1538_p4 = scmp.ne.s32.totalorder %s1107_s16, %s1103_s15  ;;  %p36_p5 = scmp.ge.s32.totalorder %s1588_s26, 2 }
  0x16   : > { %p55_p6 = scmp.eq.s32.totalorder %s1224_s23, 0  ;;  %s64_s29 = ssub.s32 %s1123_s20, %s1586_s25 }
  0x17   : > { %s67_s30 = sadd.s32 1, %s1099_s14  ;;  %s1590_s26 = smov (%p36_p5, %s1588_s26), 0 }
  0x18   : > { %1554 = sst [smem:[#allocation19_spill]] %s1590_s26  ;;  %p1258_p7 = por %p55_p6, %p1538_p4 }
  0x19   : > { %p65_p8 = scmp.eq.s32.totalorder %s64_s29, 0  ;;  %s38_s5 = ssub.s32 %s1127_s21, %s1590_s26 }
  0x1a   : > { %s1555_s4 = scalar_select %p1258_p7, 1, 0 }
  0x1b   : > { %p74_p9 = scmp.ne.s32.totalorder %s1099_s14, %s1095_s13  ;;  %p39_p10 = scmp.eq.s32.totalorder %s38_s5, 0 }
  0x1c   : > { %p80_p11 = scmp.ne.s32.totalorder %s1095_s13, %s1091_s12  ;;  %p130_p0 = scmp.eq.s32.totalorder %s1224_s23, 7 }
  0x1d   : > { %s1269_s6 = scalar_select %p65_p8, %s1099_s14, %s67_s30  }
  0x1e   : > { %s1272_s7 = scalar_select %p39_p10, %s1111_s17, %s41_s27  }
  0x1f   : > { %1556 = sst [smem:[#allocation20_spill]] %s1269_s6  ;;  %p1276_p12 = por %p74_p9, %p49_p2 }
  0x20   : > { %1557 = sst [smem:[#allocation21_spill]] %s1272_s7  ;;  %p1282_p13 = por %p80_p11, %p55_p6 }
  0x21   : > { %s1558_s8 = scalar_select %p1276_p12, 1, 0 }
  0x22   : > { %s1559_s9 = scalar_select %p1282_p13, 1, 0 }
  0x23   : > { %p136_p5 = scmp.eq.s32.totalorder %s658_s24, 7  ;;  %p1290_p4 = por %p130_p0, %p48_p1 }
  0x24   : > { %p1561_p8 = scmp.ne.s32.totalorder %s1107_s16, %s1103_s15  ;;  %p660_p2 = scmp.ge.s32.totalorder %s1131_s22, 8 }
  0x25   : > { %s1560_s10 = scalar_select %p1290_p4, 1, 0 }
  0x26   : > { %p1297_p10 = por %p136_p5, %p1561_p8  ;;  %152 = sbr.rel (%p660_p2) target bundleno = 110 (0x6e), region = 16 }
  0x27   : > { %s156_s12 = sand.u32 (!%p660_p2), 1, %s1111_s17   ;;  %s662_s27 = sshll.u32 (!%p660_p2), %s1127_s21, 7 }
  0x28   : > { %s1562_s11 = scalar_select %p1297_p10, 1, 0 }
  0x29   : > { %s661_s29 = sshll.u32 (!%p660_p2), %s156_s12, 3  ;;  %s1564_s0 = sld [smem:[#allocation23_spill]] (!%p660_p2) }
  0x2a   : > { %1563 = sst [smem:[#allocation22_spill]] %s1562_s11  ;;  %s160_s26 = scalar_lea.vmem (!%p660_p2), [#allocation3], %s661_s29 }
  0x2b   : > { %s167_s25 = sshll.u32 (!%p660_p2), %s160_s26, 4  ;;  %s157_s7 = scalar_lea.sflag (!%p660_p2), [#allocation4], %s156_s12  ;;  %s168_s25 = int_to_ptr.vmem [resolvable:$true] %s167_s25 }
  0x2f   : > { %s1307_s5 = scalar_lea.hbm %s1564_s0, %s662_s27  ;;  %s953_s11 = scalar_lea.hbm %s1564_s0, 256 }
  0x30   : > { %s949_s6 = scalar_lea.hbm %s1307_s5, 128  ;;  %p954_p11 = scmp.lt.u32.totalorder %s1307_s5, %s1564_s0 }
  0x31   : > { %p950_p1 = scmp.ne.s32.totalorder %s1307_s5, %s949_s6  ;;  %p955_p0 = scmp.lt.u32.totalorder %s953_s11, %s949_s6 }
  0x32   : > { %p957_p8 = scmp.lt.u32.totalorder %s949_s6, %s1307_s5 }
  0x33   : > { %p951_p6 = pnand %p950_p1, %p1241_p3  ;;  %p956_p5 = por %p955_p0, %p954_p11 }
  0x35   : > { %p952_p9 = pneg %p951_p6  ;;  %p958_p2 = por %p957_p8, %p956_p5 }
  0x37   : > { %p959_p10 = pnand %p958_p2, %p952_p9 }
  0x39   : > { %962 = shalt.err (!%p959_p10)
}
  0x3a   : > { %s963_s26 = scalar_lea.vmem %s168_s25, 128  ;;  %s1133_s12 = smov [#allocation3]  }
  0x3b   : > { %p964_p4 = scmp.ne.s32.totalorder %s168_s25, %s963_s26  ;;  %s967_s29 = sshll.u32 %s1133_s12, 4  ;;  %s968_s29 = int_to_ptr.vmem [resolvable:$false] %s967_s29 }
  0x3c   : > { %s969_s17 = scalar_lea.vmem %s968_s29, 256  ;;  %p970_p13 = scmp.lt.s32.totalorder %s168_s25, %s968_s29 }
  0x3d   : > { %p965_p1 = pnand %p964_p4, %p1241_p3  ;;  %p971_p7 = scmp.lt.s32.totalorder %s969_s17, %s963_s26 }
  0x3f   : > { %p966_p6 = pneg %p965_p1  ;;  %p972_p12 = por %p971_p7, %p970_p13 }
  0x41   : > { %p973_p0 = pnand %p972_p12, %p966_p6 }
  0x43   : > { %976 = shalt.err (!%p973_p0)
}
  0x44   : > { %825 = dma.hbm_to_vmem [thread:$0]  (%p1241_p3), %s1307_s5, 128, %s168_s25, %s157_s7  }
  0x45   : > { %s174_s21 = sand.u32 1, %s1131_s22   ;;  %s176_s6 = sand.u32 1, %s1099_s14  }
  0x46   : > { %s663_s11 = sshll.u32 %s176_s6, 8  ;;  %s682_s30 = sshll.u32 %s1123_s20, 11 }
  0x47   : > { %s1565_s1 = sld [smem:[#allocation24_spill]]  ;;  %p1566_p4 = scmp.ne.s32.totalorder %s1558_s8, 0 }
  0x48   : > { %s178_s25 = scalar_lea.vmem [#allocation6], %s663_s11  ;;  %s1134_s12 = smov 8192  }
  0x49   : > { %s826_s28 = scalar_select %p1566_p4, [#allocation0], [#allocation12] }
  0x4a   : > { %s197_s7 = sshll.u32 %s178_s25, 4  ;;  %827 = sst [smem:[#allocation11]] (%p1566_p4), %s1134_s12  ;;  %s198_s7 = int_to_ptr.vmem [resolvable:$true] %s197_s7 }
  0x4b   : > { %s189_s5 = sld [smem:[%s826_s28]]   ;;  %s1135_s29 = smov 2048  }
  0x4c   : > { %828 = sst [smem:[#allocation11 + $0x1]] (%p1566_p4), %s1135_s29  ;;  %s1136_s17 = smov 16  }
  0x4d   : > { %s184_s26 = scalar_lea.hbm %s1565_s1, %s682_s30  ;;  %829 = sst [smem:[#allocation11 + $0x2]] (%p1566_p4), %s1136_s17 }
  0x4e   : > { %s1137_s0 = smov 128   ;;  %s1138_s11 = smov 8  }
  0x4f   : > { %830 = sst [smem:[#allocation11 + $0x3]] (%p1566_p4), %s1137_s0  ;;  %s1346_s27 = scalar_lea.sflag [#allocation7], %s174_s21 }
  0x50   : > { %831 = sst [smem:[#allocation11 + $0x4]] (%p1566_p4), %s1137_s0  ;;  %s1139_s28 = smov [#allocation10]  }
  0x51   : > { %s666_s30 = sshll.u32 %s189_s5, 26  ;;  %832 = sst [smem:[#allocation11 + $0x5]] (%p1566_p4), %s1138_s11 }
  0x52   : > { %s667_s24 = sadd.s32 134217728, %s666_s30  ;;  %s668_s25 = sshll.u32 %s176_s6, 7 }
  0x53   : > { %833 = dma.general (%p1566_p4), %s184_s26, 4096, %s198_s7, %s1346_s27, %s1139_s28, [#allocation11], %s667_s24, 0  }
  0x54   : > { %s669_s12 = sshll.u32 %s1123_s20, 7  ;;  %s224_s0 = scalar_lea.vmem [#allocation8], %s668_s25 }
  0x55   : > { %s1355_s1 = scalar_lea.hbm %s1536_s2, %s669_s12  ;;  %s230_s21 = sshll.u32 %s224_s0, 4  ;;  %s1357_s21 = int_to_ptr.vmem [resolvable:$true] %s230_s21 }
  0x56   : > { %s977_s5 = scalar_lea.hbm %s1355_s1, 2048  ;;  %s981_s7 = scalar_lea.hbm %s1536_s2, 8192 }
  0x57   : > { %p978_p3 = scmp.ne.s32.totalorder %s1355_s1, %s977_s5  ;;  %p982_p13 = scmp.lt.u32.totalorder %s1355_s1, %s1536_s2 }
  0x58   : > { %p983_p10 = scmp.lt.u32.totalorder %s981_s7, %s977_s5  ;;  %p985_p11 = scmp.lt.u32.totalorder %s977_s5, %s1355_s1 }
  0x59   : > { %p979_p7 = pnand %p978_p3, %p1566_p4 }
  0x5a   : > { %p984_p9 = por %p983_p10, %p982_p13 }
  0x5b   : > { %p980_p12 = pneg %p979_p7 }
  0x5c   : > { %p986_p5 = por %p985_p11, %p984_p9 }
  0x5e   : > { %p987_p8 = pnand %p986_p5, %p980_p12 }
  0x60   : > { %990 = shalt.err (!%p987_p8)
}
  0x61   : > { %s991_s24 = scalar_lea.vmem %s1357_s21, 2048  ;;  %s1140_s28 = smov [#allocation8]  }
  0x62   : > { %p992_p2 = scmp.ne.s32.totalorder %s1357_s21, %s991_s24  ;;  %s995_s25 = sshll.u32 %s1140_s28, 4  ;;  %s996_s25 = int_to_ptr.vmem [resolvable:$false] %s995_s25 }
  0x63   : > { %s997_s12 = scalar_lea.vmem %s996_s25, 4096  ;;  %p998_p0 = scmp.lt.s32.totalorder %s1357_s21, %s996_s25 }
  0x64   : > { %p993_p1 = pnand %p992_p2, %p1566_p4  ;;  %p999_p3 = scmp.lt.s32.totalorder %s997_s12, %s991_s24 }
  0x66   : > { %p994_p6 = pneg %p993_p1  ;;  %p1000_p7 = por %p999_p3, %p998_p0 }
  0x68   : > { %p1001_p13 = pnand %p1000_p7, %p994_p6 }
  0x6a   : > { %1004 = shalt.err (!%p1001_p13)
}
  0x6b   : > { %s1141_s29 = smov 512   ;;  %s1142_s17 = smov 128  }
  0x6c   : > { %s1143_s0 = smov 8  }
  0x6d   : > { %834 = dma.hbm_to_vmem [thread:$0]  (%p1566_p4), %s1355_s1, 2048, %s1357_s21, %s1346_s27, %s1141_s29, %s1142_s17, %s1143_s0  }
  0x6e PF: > { %p670_p12 = scmp.ge.s32.totalorder %s1131_s22, 1  ;;  %p238_p10 = scmp.lt.s32.totalorder %s1131_s22, 9 }
  0x70   : > { %p239_p9 = pnand %p670_p12, %p238_p10 }
  0x71   : > { %s1384_s5 = sand.u32 (!%p239_p9), 1, %s1107_s16   ;;  %p1567_p4 = scmp.ne.s32.totalorder (!%p239_p9), %s1555_s4, 0 }
  0x72   : > { %242 = sbr.rel (%p239_p9) target bundleno = 694 (0x2b6), region = 32  ;;  %s671_s6 = sshll.u32 (!%p239_p9), %s1384_s5, 3 }
  0x73   : > { %s245_s26 = scalar_lea.sflag (!%p239_p9), [#allocation4], %s1384_s5  ;;  %s1390_s7 = scalar_lea.vmem (!%p239_p9), [#allocation3], %s671_s6 }
  0x79   : > { %1078 = dma.done.wait (%p1567_p4), %s245_s26, 128  }
  0x7a   : > { %1080 = vsyncadd (%p1567_p4), %s245_s26, 4294967168  ;;  %s253_s1 = sand.u32 1, %s1224_s23   ;;  %s255_s8 = sand.u32 1, %s1095_s13  }
  0x7b   : > { %s672_s27 = sshll.u32 %s255_s8, 8  ;;  %s254_s21 = scalar_lea.sflag [#allocation7], %s253_s1 }
  0x7c   : > { %s1398_s30 = scalar_lea.vmem [#allocation6], %s672_s27  ;;  %p1568_p11 = scmp.ne.s32.totalorder %s1559_s9, 0 }
  0x7e   : > { %1082 = dma.done.wait (%p1568_p11), %s254_s21, 6144  }
  0x7f   : > { %1084 = vsyncadd (%p1568_p11), %s254_s21, 4294961152  ;;  %v1144_v0 = vmov 0.0|0.0   ;;  %v317_v1 = vld [vmem:[%s1398_s30 + $0x80] sm:$0xff]  ;;  %v318_v2 = vld [vmem:[%s1398_s30 + $0x88] sm:$0xff]  ;;  %s673_s23 = sshll.u32 %s255_s8, 7  ;;  %vm1145_vm0 = vmmov 0  }
  0x80   : > { %801 = vmatprep.subr.bf16.mxu1 %v1144_v0  ;;  %v301_v3 = vld [vmem:[%s1398_s30] sm:$0xff]  ;;  %v769_v4 = vpack.c.bf16 %v318_v2, %v317_v1  ;;  %v302_v5 = vld [vmem:[%s1398_s30 + $0x8] sm:$0xff]  ;;  %v319_v6 = vld [vmem:[%s1398_s30 + $0x90] sm:$0xff]  ;;  %s1419_s4 = scalar_lea.vmem [#allocation8], %s673_s23  ;;  %s298_s9 = scalar_lea.vmem [#allocation9], %s671_s6 }
  0x81   : > { %v320_v7 = vld [vmem:[%s1398_s30 + $0x98] sm:$0xff]  ;;  %v771_v8 = vpack.c.bf16 %v302_v5, %v301_v3  ;;  %v303_v10 = vld [vmem:[%s1398_s30 + $0x10] sm:$0xff]  ;;  %v321_v12 = vld [vmem:[%s1398_s30 + $0xa0] sm:$0xff]  ;;  %p676_p5 = scmp.ne.s32.totalorder %s1115_s18, 0 }
  0x82   : > { %v773_v9 = vpack.c.bf16 %v320_v7, %v319_v6  ;;  %770 = vmatprep.subr.bf16.mxu0 %v769_v4  ;;  %v304_v11 = vld [vmem:[%s1398_s30 + $0x18] sm:$0xff]  ;;  %v322_v13 = vld [vmem:[%s1398_s30 + $0xa8] sm:$0xff]  ;;  %v412_v17 = vld [vmem:[%s1419_s4] sm:$0xff] }
  0x83   : > { %772 = vmatpush3.bf16.xpose.msra.mxu0 %v771_v8  ;;  %v775_v14 = vpack.c.bf16 %v304_v11, %v303_v10  ;;  %v777_v15 = vpack.c.bf16 %v322_v13, %v321_v12  ;;  %v1416_v16 = vld [vmem:[%s1390_s7] sm:$0xff]  ;;  %v413_v18 = vld [vmem:[%s1419_s4 + $0x8] sm:$0xff]  ;;  %v305_v20 = vld [vmem:[%s1398_s30 + $0x20] sm:$0xff]  ;;  %v1146_v11 = vmov 0.0  }
  0x84   : > { %774 = vmatprep.subr.bf16.mxu0 %v773_v9  ;;  %715 = vmatprep.mubr.f32.mxu0 %v1416_v16  ;;  %v802_v19 = vpack.c.bf16 %v413_v18, %v412_v17  ;;  %v306_v21 = vld [vmem:[%s1398_s30 + $0x28] sm:$0xff]  ;;  %v323_v22 = vld [vmem:[%s1398_s30 + $0xb0] sm:$0xff]  ;;  %v324_v23 = vld [vmem:[%s1398_s30 + $0xb8] sm:$0xff] }
  0x85   : > { %v414_v24 = vld [vmem:[%s1419_s4 + $0x10] sm:$0xff]  ;;  %v415_v25 = vld [vmem:[%s1419_s4 + $0x18] sm:$0xff]  ;;  %v779_v26 = vpack.c.bf16 %v306_v21, %v305_v20  ;;  %v781_v27 = vpack.c.bf16 %v324_v23, %v323_v22  ;;  %v325_v31 = vld [vmem:[%s1398_s30 + $0xc0] sm:$0xff]  ;;  %766 = vmatprep.mubr.msk.f32.mxu1 %vm1145_vm0, %v1146_v11 }
  0x86   : > { %803 = vmatpush3.bf16.xpose.msra.mxu1 %v802_v19  ;;  %v805_v28 = vpack.c.bf16 %v415_v25, %v414_v24  ;;  %v307_v29 = vld [vmem:[%s1398_s30 + $0x30] sm:$0xff]  ;;  %v308_v30 = vld [vmem:[%s1398_s30 + $0x38] sm:$0xff]  ;;  %v326_v32 = vld [vmem:[%s1398_s30 + $0xc8] sm:$0xff] }
  0x87   : > { %804 = vmatprep.subr.bf16.mxu1 %v1144_v0  ;;  %v416_v33 = vld [vmem:[%s1419_s4 + $0x20] sm:$0xff]  ;;  %v417_v34 = vld [vmem:[%s1419_s4 + $0x28] sm:$0xff]  ;;  %v783_v35 = vpack.c.bf16 %v308_v30, %v307_v29  ;;  %v785_v36 = vpack.c.bf16 %v326_v32, %v325_v31  ;;  %v327_v40 = vld [vmem:[%s1398_s30 + $0xd0] sm:$0xff] }
  0x88   : > { %v808_v37 = vpack.c.bf16 %v417_v34, %v416_v33  ;;  %v309_v38 = vld [vmem:[%s1398_s30 + $0x40] sm:$0xff]  ;;  %v310_v39 = vld [vmem:[%s1398_s30 + $0x48] sm:$0xff]  ;;  %v328_v41 = vld [vmem:[%s1398_s30 + $0xd8] sm:$0xff] }
  0x89   : > { %v418_v42 = vld [vmem:[%s1419_s4 + $0x30] sm:$0xff]  ;;  %v419_v43 = vld [vmem:[%s1419_s4 + $0x38] sm:$0xff]  ;;  %v787_v44 = vpack.c.bf16 %v310_v39, %v309_v38  ;;  %v789_v45 = vpack.c.bf16 %v328_v41, %v327_v40  ;;  %v329_v49 = vld [vmem:[%s1398_s30 + $0xe0] sm:$0xff] }
  0x8a   : > { %v811_v46 = vpack.c.bf16 %v419_v43, %v418_v42  ;;  %v311_v47 = vld [vmem:[%s1398_s30 + $0x50] sm:$0xff]  ;;  %v312_v48 = vld [vmem:[%s1398_s30 + $0x58] sm:$0xff]  ;;  %v330_v50 = vld [vmem:[%s1398_s30 + $0xe8] sm:$0xff] }
  0x8b   : > { %776 = vmatpush3.bf16.xpose.msra.mxu0 %v775_v14  ;;  %v791_v51 = vpack.c.bf16 %v312_v48, %v311_v47  ;;  %v793_v52 = vpack.c.bf16 %v330_v50, %v329_v49  ;;  %v313_v53 = vld [vmem:[%s1398_s30 + $0x60] sm:$0xff]  ;;  %v314_v54 = vld [vmem:[%s1398_s30 + $0x68] sm:$0xff]  ;;  %v331_v55 = vld [vmem:[%s1398_s30 + $0xf0] sm:$0xff] }
  0x8c   : > { %778 = vmatprep.subr.bf16.mxu0 %v777_v15  ;;  %v332_v56 = vld [vmem:[%s1398_s30 + $0xf8] sm:$0xff]  ;;  %v795_v57 = vpack.c.bf16 %v314_v54, %v313_v53  ;;  %v315_v59 = vld [vmem:[%s1398_s30 + $0x70] sm:$0xff]  ;;  %v420_v62 = vld [vmem:[%s1419_s4 + $0x40] sm:$0xff] }
  0x8d   : > { %v797_v58 = vpack.c.bf16 %v332_v56, %v331_v55  ;;  %v316_v60 = vld [vmem:[%s1398_s30 + $0x78] sm:$0xff]  ;;  %v421_v63 = vld [vmem:[%s1419_s4 + $0x48] sm:$0xff]  ;;  %v422_v2 = vld [vmem:[%s1419_s4 + $0x50] sm:$0xff] }
  0x8e   : > { %806 = vmatpush3.bf16.xpose.msra.mxu1 %v805_v28  ;;  %v799_v61 = vpack.c.bf16 %v316_v60, %v315_v59  ;;  %v814_v1 = vpack.c.bf16 %v421_v63, %v420_v62  ;;  %v423_v3 = vld [vmem:[%s1419_s4 + $0x58] sm:$0xff]  ;;  %v424_v5 = vld [vmem:[%s1419_s4 + $0x60] sm:$0xff]  ;;  %v425_v6 = vld [vmem:[%s1419_s4 + $0x68] sm:$0xff] }
  0x8f   : > { %807 = vmatprep.subr.bf16.mxu1 %v1144_v0  ;;  %v817_v4 = vpack.c.bf16 %v423_v3, %v422_v2  ;;  %v820_v7 = vpack.c.bf16 %v425_v6, %v424_v5  ;;  %v426_v8 = vld [vmem:[%s1419_s4 + $0x70] sm:$0xff]  ;;  %v427_v9 = vld [vmem:[%s1419_s4 + $0x78] sm:$0xff] }
  0x90   : > { %v823_v10 = vpack.c.bf16 %v427_v9, %v426_v8 }
  0x93   : > { %780 = vmatpush3.bf16.xpose.msra.mxu0 %v779_v26 }
  0x94   : > { %782 = vmatprep.subr.bf16.mxu0 %v781_v27 }
  0x96   : > { %809 = vmatpush3.bf16.xpose.msra.mxu1 %v808_v37 }
  0x97   : > { %810 = vmatprep.subr.bf16.mxu1 %v1144_v0 }
  0x9b   : > { %784 = vmatpush3.bf16.xpose.msra.mxu0 %v783_v35 }
  0x9c   : > { %786 = vmatprep.subr.bf16.mxu0 %v785_v36 }
  0x9e   : > { %812 = vmatpush3.bf16.xpose.msra.mxu1 %v811_v46 }
  0x9f   : > { %813 = vmatprep.subr.bf16.mxu1 %v1144_v0 }
  0xa3   : > { %788 = vmatpush3.bf16.xpose.msra.mxu0 %v787_v44 }
  0xa4   : > { %790 = vmatprep.subr.bf16.mxu0 %v789_v45 }
  0xa6   : > { %815 = vmatpush3.bf16.xpose.msra.mxu1 %v814_v1 }
  0xa7   : > { %816 = vmatprep.subr.bf16.mxu1 %v1144_v0 }
  0xab   : > { %792 = vmatpush3.bf16.xpose.msra.mxu0 %v791_v51 }
  0xac   : > { %794 = vmatprep.subr.bf16.mxu0 %v793_v52 }
  0xae   : > { %818 = vmatpush3.bf16.xpose.msra.mxu1 %v817_v4 }
  0xaf   : > { %819 = vmatprep.subr.bf16.mxu1 %v1144_v0 }
  0xb3   : > { %796 = vmatpush3.bf16.xpose.msra.mxu0 %v795_v57 }
  0xb4   : > { %798 = vmatprep.subr.bf16.mxu0 %v797_v58 }
  0xb6   : > { %821 = vmatpush3.bf16.xpose.msra.mxu1 %v820_v7 }
  0xb7   : > { %822 = vmatprep.subr.bf16.mxu1 %v1144_v0 }
  0xbb   : > { %800 = vmatpush3.bf16.xpose.msra.mxu0 %v799_v61 }
  0xbe   : > { %824 = vmatpush3.bf16.xpose.msra.mxu1 %v823_v10 }
  0xc2   : > { %716 = vmatmul.mubr.f32.vlgmr.msra.gmra.mrb[0].mxu0 %v1416_v16 }
 0x195   : > { %v399_v12 = vpop.f32.mrb[0].mxu0 }
 0x196   : > { %v675_v13 = vmul.f32 -1.442695, %v399_v12  ;;  %v401_v14 = vpop.f32.mrb[1].mxu0 }
 0x198   : > { %945 = vpow2.f32 %v675_v13 }
 0x1a2   : > { %v946_v15 = vpop.eup %945 }
 0x1a3   : > { %v407_v16 = vadd.f32 1.0, %v946_v15 }
 0x1a5   : > { %947 = vrcp.f32 %v407_v16 }
 0x1af   : > { %v948_v17 = vpop.eup %947 }
 0x1b0   : > { %v410_v18 = vmul.f32 %v948_v17, %v399_v12 }
 0x1b2   : > { %v411_v19 = vmul.f32 %v410_v18, %v401_v14 }
 0x1b4   : > { %767 = vmatmul.mubr.f32.vlgmr.msra.gmra.mrb[0].mxu1 %v411_v19 }
 0x282   : > { %501 = sbr.rel (%p676_p5) target bundleno = 649 (0x289), region = 48 }
 0x287   : > { %v494_v0 = vpop.f32.mrb[0].mxu1 }
 0x288   : > { %v768_v20 = vpop.f32.mrb[1].mxu1  ;;  %502 = vst [vmem:[#allocation2] sm:$0xff] (!%p676_p5), %v494_v0 }
 0x289 PF: > { %p503_p8 = scmp.gt.s32.totalorder %s1115_s18, 0  ;;  %p504_p2 = scmp.lt.s32.totalorder %s1115_s18, 3 }
 0x28b   : > { %p505_p1 = pnand %p504_p2, %p503_p8 }
 0x28d   : > { %508 = sbr.rel (%p505_p1) target bundleno = 660 (0x294), region = 52 }
 0x28f   : > { %v509_v21 = vld [vmem:[#allocation2] sm:$0xff] (!%p505_p1) }
 0x290   : > { %v510_v22 = vadd.f32 (!%p505_p1), %v509_v21, %v494_v0 }
 0x292   : > { %511 = vst [vmem:[#allocation2] sm:$0xff] (!%p505_p1), %v510_v22 }
 0x294 PF: > { %p677_p6 = scmp.ne.s32.totalorder %s1115_s18, 3 }
 0x296   : > { %515 = sbr.rel (%p677_p6) target bundleno = 669 (0x29d), region = 56 }
 0x299   : > { %v516_v23 = vld [vmem:[#allocation2] sm:$0xff] (!%p677_p6) }
 0x29a   : > { %v517_v24 = vadd.f32 (!%p677_p6), %v516_v23, %v494_v0 }
 0x29c   : > { %518 = vst [vmem:[%s298_s9] sm:$0xff] (!%p677_p6), %v517_v24 }
 0x29d PF: > { %s679_s11 = sshll.u32 %s1119_s19, 7  ;;  %s533_s12 = sshll.u32 %s298_s9, 4  ;;  %s534_s12 = int_to_ptr.vmem [resolvable:$true] %s533_s12 }
 0x29e   : > { %s1477_s25 = scalar_lea.hbm %s1537_s3, %s679_s11  ;;  %s520_s29 = scalar_lea.sflag [#allocation5], %s1384_s5 }
 0x29f   : > { %s1005_s17 = scalar_lea.vmem %s534_s12, 128  ;;  %p1569_p3 = scmp.ne.s32.totalorder %s1560_s10, 0 }
 0x2a0   : > { %p1006_p0 = scmp.ne.s32.totalorder %s534_s12, %s1005_s17  ;;  %s1147_s18 = smov [#allocation9]  }
 0x2a1   : > { %s1009_s0 = sshll.u32 %s1147_s18, 4  ;;  %s1010_s0 = int_to_ptr.vmem [resolvable:$false] %s1009_s0 }
 0x2a2   : > { %p1007_p7 = pnand %p1006_p0, %p1569_p3  ;;  %s1011_s6 = scalar_lea.vmem %s1010_s0, 256 }
 0x2a3   : > { %p1012_p12 = scmp.lt.s32.totalorder %s534_s12, %s1010_s0  ;;  %p1013_p10 = scmp.lt.s32.totalorder %s1011_s6, %s1005_s17 }
 0x2a4   : > { %p1008_p13 = pneg %p1007_p7 }
 0x2a5   : > { %p1014_p9 = por %p1013_p10, %p1012_p12 }
 0x2a7   : > { %p1015_p4 = pnand %p1014_p9, %p1008_p13 }
 0x2a9   : > { %1018 = shalt.err (!%p1015_p4)
}
 0x2aa   : > { %s1019_s19 = scalar_lea.hbm %s1477_s25, 128  ;;  %s1023_s7 = scalar_lea.hbm %s1537_s3, 256 }
 0x2ab   : > { %p1020_p11 = scmp.ne.s32.totalorder %s1477_s25, %s1019_s19  ;;  %p1024_p2 = scmp.lt.u32.totalorder %s1477_s25, %s1537_s3 }
 0x2ac   : > { %p1025_p1 = scmp.lt.u32.totalorder %s1023_s7, %s1019_s19  ;;  %p1027_p0 = scmp.lt.u32.totalorder %s1019_s19, %s1477_s25 }
 0x2ad   : > { %p1021_p5 = pnand %p1020_p11, %p1569_p3 }
 0x2ae   : > { %p1026_p6 = por %p1025_p1, %p1024_p2 }
 0x2af   : > { %p1022_p8 = pneg %p1021_p5 }
 0x2b0   : > { %p1028_p7 = por %p1027_p0, %p1026_p6 }
 0x2b2   : > { %p1029_p13 = pnand %p1028_p7, %p1022_p8 }
 0x2b4   : > { %1032 = shalt.err (!%p1029_p13)
}
 0x2b5   : > { %838 = dma.vmem_to_hbm [thread:$0]  (%p1569_p3), %s534_s12, 128, %s1477_s25, %s520_s29  }
 0x2b6 PF: > { %s1570_s27 = sld [smem:[#allocation22_spill]]  ;;  %p844_p12 = scmp.ge.s32.totalorder %s1131_s22, 2 }
 0x2b7   : > { %s545_s21 = sand.u32 1, %s1103_s15  }
 0x2b8   : > { %s546_s30 = scalar_lea.sflag [#allocation5], %s545_s21 }
 0x2bc   : > { %p1571_p10 = scmp.ne.s32.totalorder %s1570_s27, 0 }
 0x2be   : > { %p841_p9 = pnand %p844_p12, %p1571_p10 }
 0x2c0   : > { %1086 = dma.done.wait (!%p841_p9), %s546_s30, 128  }
 0x2c1   : > { %1088 = vsyncadd (!%p841_p9), %s546_s30, 4294967168  ;;  %s22_s22 = sadd.s32 1, %s1131_s22   ;;  %s1572_s23 = sld [smem:[#allocation20_spill]] }
 0x2c2   : > { %p19_p4 = scmp.ge.s32.totalorder %s22_s22, 10   ;;  %s1573_s10 = sld [smem:[#allocation16_spill]] }
 0x2c3   : > { %s1574_s17 = sld [smem:[#allocation21_spill]]  ;;  %s1575_s19 = sld [smem:[#allocation17_spill]] }
 0x2c4   : > { %s1576_s4 = sld [smem:[#allocation18_spill]]  ;;  %s1577_s21 = sld [smem:[#allocation19_spill]] }
 0x2c5   : > { %s1578_s12 = smov %s1095_s13  ;;  %s1579_s13 = smov %s1099_s14 }
 0x2c6   : > { %s1581_s15 = smov %s1107_s16  ;;  %s1583_s18 = smov %s1123_s20 }
 0x2c7   : > { %s1580_s14 = smov %s1572_s23  ;;  %21 = sbr.rel (!%p19_p4) target bundleno = 14 (0xe), region = 118 }
 0x2c8   : > { %s1582_s16 = smov %s1573_s10 }
 0x2ca   : > { %s1584_s20 = smov %s1576_s4 }
 0x2ce   :  { %551 = vsyncpa [#allocation4], 1 }
 0x2cf   :  { %553 = vsyncpa [#allocation4 + $0x1], 1 }
 0x2d0   :  { %554 = vsyncpa [#allocation7], 1 }
 0x2d1   :  { %556 = vsyncpa [#allocation7 + $0x1], 1 }
 0x2d2   :  { %557 = vsyncpa [#allocation5], 1 }
 0x2d3   :  { %559 = vsyncpa [#allocation5 + $0x1], 1 }

</bundles_post_ra>
